<compile_context>
chip_gen: v6e
topology: v6e:2x2x1
jax: 0.10.0
libtpu: 0.0.40
codegen_flags: <defaults>
</compile_context>

<pallas_src>
import functools
import math

import jax
import jax.numpy as jnp
from jax import lax
from jax.experimental import pallas as pl
from jax.experimental.pallas import tpu as pltpu

_LANES = 128


def _cdiv(a, b):
    return -(-a // b)


def _chip_budgets():
    """(default logits-block bytes, vmem_limit cap) — conservative unless we
    positively detect a 128-MiB-VMEM generation (v5e/v6e)."""
    block_bytes, vmem_cap = 4 << 20, 56 << 20          # safe on v7x (64 MiB VMEM)
    try:
        info = pltpu.get_tpu_info()
        vmem_phys = getattr(info, "vmem_capacity_bytes", 0) or 0
        if vmem_phys >= (100 << 20):                    # v5e / v6e class
            block_bytes, vmem_cap = 8 << 20, 100 << 20
    except Exception:
        pass
    return block_bytes, vmem_cap


def _softmax_over_classes(x, apply_softmax):
    # x: (C, ...) f32; softmax over axis 0 (class axis).
    if not apply_softmax:
        return x
    m = jnp.max(x, axis=0, keepdims=True)
    e = jnp.exp(x - m)
    s = jnp.sum(e, axis=0, keepdims=True)
    # approx reciprocal runs on the EUP slot (VALU is the binding unit here).
    return e * pl.reciprocal(s, approx=True)


# --------------------------------------------------------------------------
# Lane/sublane-dense kernel: blocks (1, C, R_TILE, 128).  Used when the
# spatial size is a multiple of 128 (free reshape, no logits padding).
# --------------------------------------------------------------------------
def _dice_kernel_tiled(x_ref, t_ref, out_ref, acc_num, acc_pp, acc_cnt, *,
                       smooth, apply_softmax, mask_tail):
    s_id = pl.program_id(1)
    n_s = pl.num_programs(1)

    @pl.when(s_id == 0)
    def _():
        acc_num[...] = jnp.zeros_like(acc_num)
        acc_pp[...] = jnp.zeros_like(acc_pp)
        acc_cnt[...] = jnp.zeros_like(acc_cnt)

    x = x_ref[0].astype(jnp.float32)          # (C, R_TILE, 128)
    t = t_ref[0, 0].astype(jnp.int32)         # (R_TILE, 128); padded rows = -1
    C = x.shape[0]

    p = _softmax_over_classes(x, apply_softmax)

    # Per-class numerator and pixel count.  Static Python loop over the small
    # compile-time C: dense (R_TILE, 128) planes, no (C, R_TILE, 128) iota /
    # match temporaries.  Padded targets (-1) never match -> no extra mask.
    num_rows, cnt_rows = [], []
    for c in range(C):
        m_c = t == c
        num_rows.append(jnp.sum(jnp.where(m_c, p[c], 0.0), axis=0,
                                keepdims=True))                 # (1, 128)
        cnt_rows.append(jnp.sum(m_c.astype(jnp.float32), axis=0,
                                keepdims=True))                 # (1, 128)
    acc_num[...] += jnp.concatenate(num_rows, axis=0)           # (C, 128)
    acc_cnt[...] += jnp.concatenate(cnt_rows, axis=0)           # (C, 128)

    # sum(p^2): garbage pixels exist only in the (partial) last block, so the
    # validity mask is applied on the last tile only.
    if mask_tail:
        @pl.when(s_id < n_s - 1)
        def _():
            acc_pp[...] += jnp.sum(p * p, axis=1)

        @pl.when(s_id == n_s - 1)
        def _():
            valid = (t >= 0)[None]
            acc_pp[...] += jnp.sum(jnp.where(valid, p * p, 0.0), axis=1)
    else:
        acc_pp[...] += jnp.sum(p * p, axis=1)

    @pl.when(s_id == n_s - 1)
    def _():
        num = smooth + 2.0 * jnp.sum(acc_num[...], axis=-1, keepdims=True)
        den = (smooth
               + jnp.sum(acc_pp[...], axis=-1, keepdims=True)
               + jnp.sum(acc_cnt[...], axis=-1, keepdims=True))
        out_ref[0] = 1.0 - num / den


# --------------------------------------------------------------------------
# Flat fallback kernel: blocks (1, C, TILE_S).  Used when the spatial size is
# not a multiple of 128 (avoids any logits padding / copy in HBM).
# --------------------------------------------------------------------------
def _dice_kernel_flat(x_ref, t_ref, out_ref, acc_num, acc_pp, acc_cnt, *,
                      smooth, apply_softmax, mask_tail):
    s_id = pl.program_id(1)
    n_s = pl.num_programs(1)

    @pl.when(s_id == 0)
    def _():
        acc_num[...] = jnp.zeros_like(acc_num)
        acc_pp[...] = jnp.zeros_like(acc_pp)
        acc_cnt[...] = jnp.zeros_like(acc_cnt)

    x = x_ref[0].astype(jnp.float32)          # (C, TILE_S)
    t = t_ref[0].astype(jnp.int32)            # (1, TILE_S); padded lanes = -1

    p = _softmax_over_classes(x, apply_softmax)

    cls = lax.broadcasted_iota(jnp.int32, x.shape, 0)            # (C, TILE_S)
    match = cls == t
    acc_num[...] += jnp.sum(jnp.where(match, p, 0.0), axis=1, keepdims=True)
    acc_cnt[...] += jnp.sum(match.astype(jnp.float32), axis=1, keepdims=True)

    if mask_tail:
        @pl.when(s_id < n_s - 1)
        def _():
            acc_pp[...] += jnp.sum(p * p, axis=1, keepdims=True)

        @pl.when(s_id == n_s - 1)
        def _():
            valid = t >= 0
            acc_pp[...] += jnp.sum(jnp.where(valid, p * p, 0.0),
                                   axis=1, keepdims=True)
    else:
        acc_pp[...] += jnp.sum(p * p, axis=1, keepdims=True)

    @pl.when(s_id == n_s - 1)
    def _():
        num = smooth + 2.0 * acc_num[...]
        den = smooth + acc_pp[...] + acc_cnt[...]
        out_ref[0] = 1.0 - num / den


# --------------------------------------------------------------------------
# Wrapper
# --------------------------------------------------------------------------
def dice_loss(logits, target, *, num_classes, smooth=1.0, prediction_logit=True,
              max_block_bytes=None):
    """Dice loss matching PyTorch DiceLoss.forward for integer class targets.

    logits: (B, C, *spatial) float (f32 or bf16)
    target: (B, *spatial) integer class indices in [0, num_classes)
    """
    if not (isinstance(num_classes, int) and num_classes > 0):
        # TODO(synk): soft-target / num_classes=None path not implemented.
        raise NotImplementedError("dice_loss requires integer class targets")
    B, C = logits.shape[0], logits.shape[1]
    assert num_classes == C
    S = math.prod(logits.shape[2:])

    itemsize = logits.dtype.itemsize
    default_block, vmem_cap = _chip_budgets()
    block_bytes = default_block if max_block_bytes is None else int(max_block_bytes)

    t_dtype = jnp.int8 if C <= 127 else jnp.int32
    x = logits.reshape(B, C, S)                       # free reshape, any dtype
    t = target.reshape(B, 1, S).astype(t_dtype)       # tiny vs. logits

    if S % _LANES == 0:
        # Lane/sublane-dense layout: free reshape, ragged last block allowed.
        R = S // _LANES
        r_budget = max(8, (block_bytes // (C * _LANES * itemsize)) // 8 * 8)
        r_tile = min(r_budget, R)
        n_tiles = _cdiv(R, r_tile)
        mask_tail = (R % r_tile) != 0
        x = x.reshape(B, C, R, _LANES)
        t = t.reshape(B, 1, R, _LANES)
        if mask_tail:  # pad only the small int8 targets with -1
            t = jnp.pad(t, ((0, 0), (0, 0), (0, n_tiles * r_tile - R), (0, 0)),
                        constant_values=-1)
        kernel = functools.partial(_dice_kernel_tiled, smooth=float(smooth),
                                   apply_softmax=bool(prediction_logit),
                                   mask_tail=mask_tail)
        in_specs = [pl.BlockSpec((1, C, r_tile, _LANES), lambda b, s: (b, 0, s, 0)),
                    pl.BlockSpec((1, 1, r_tile, _LANES), lambda b, s: (b, 0, s, 0))]
        acc_shape = (C, _LANES)
        block_pixels = C * r_tile * _LANES
    else:
        # Ragged spatial size: flat (B, C, S) blocks, no logits padding.
        s_budget = max(1024, (block_bytes // (C * itemsize)) // 1024 * 1024)
        tile_s = S if S <= s_budget else s_budget
        n_tiles = _cdiv(S, tile_s)
        mask_tail = (S % tile_s) != 0
        if mask_tail:
            t = jnp.pad(t, ((0, 0), (0, 0), (0, n_tiles * tile_s - S)),
                        constant_values=-1)
        kernel = functools.partial(_dice_kernel_flat, smooth=float(smooth),
                                   apply_softmax=bool(prediction_logit),
                                   mask_tail=mask_tail)
        in_specs = [pl.BlockSpec((1, C, tile_s), lambda b, s: (b, 0, s)),
                    pl.BlockSpec((1, 1, tile_s), lambda b, s: (b, 0, s))]
        acc_shape = (C, 1)
        block_pixels = C * tile_s

    f32_block = block_pixels * 4
    vmem_limit = int(min(vmem_cap, max(16 << 20, 10 * f32_block + (2 << 20))))

    per_bc = pl.pallas_call(
        kernel,
        out_shape=jax.ShapeDtypeStruct((B, C, 1), jnp.float32),
        grid_spec=pltpu.PrefetchScalarGridSpec(
            num_scalar_prefetch=0,
            grid=(B, n_tiles),
            in_specs=in_specs,
            out_specs=pl.BlockSpec((1, C, 1), lambda b, s: (b, 0, 0)),
            scratch_shapes=[pltpu.VMEM(acc_shape, jnp.float32)] * 3,
        ),
        compiler_params=pltpu.CompilerParams(
            dimension_semantics=("parallel", "arbitrary"),
            vmem_limit_bytes=vmem_limit),
    )(x, t)

    # final tiny reduction (mean over B*C) is glue
    return jnp.mean(per_bc)


def _dice_loss_ref(logits, target, *, num_classes, smooth=1.0,
                   prediction_logit=True):
    B, C = logits.shape[0], logits.shape[1]
    x = logits.reshape(B, C, -1).astype(jnp.float32)
    if prediction_logit:
        x = jax.nn.softmax(x, axis=1)
    t = jax.nn.one_hot(target.reshape(B, -1), num_classes, dtype=jnp.float32)
    t = jnp.moveaxis(t, -1, 1)                      # (B, C, S)
    num = smooth + jnp.sum(2.0 * x * t, axis=-1)
    den = smooth + jnp.sum(x ** 2, axis=-1) + jnp.sum(t ** 2, axis=-1)
    return jnp.mean(1.0 - num / den)


if __name__ == "__main__":
    key = jax.random.PRNGKey(0)
    keys = jax.random.split(key, 8)
    TOL = dict(atol=5e-3, rtol=5e-3)   # loosened for pl.reciprocal(approx=True)

    # 1) Standard NCHW, 128-aligned spatial size (lane-dense path, single tile).
    B, C, H, W = 2, 4, 16, 16
    logits = jax.random.normal(keys[0], (B, C, H, W), dtype=jnp.float32)
    target = jax.random.randint(keys[1], (B, H, W), 0, C, dtype=jnp.int32)
    out = jax.block_until_ready(dice_loss(logits, target, num_classes=C))
    ref = _dice_loss_ref(logits, target, num_classes=C)
    assert jnp.allclose(out, ref, **TOL), (out, ref)

    # 2) Non-128-multiple spatial size (flat fallback path, single tile).
    B2, C2, H2, W2 = 2, 3, 10, 10
    logits2 = jax.random.normal(keys[2], (B2, C2, H2, W2), dtype=jnp.float32)
    target2 = jax.random.randint(keys[3], (B2, H2, W2), 0, C2, dtype=jnp.int32)
    out2 = jax.block_until_ready(dice_loss(logits2, target2, num_classes=C2))
    ref2 = _dice_loss_ref(logits2, target2, num_classes=C2)
    assert jnp.allclose(out2, ref2, **TOL), (out2, ref2)

    # 3) Multi-tile lane-dense path with a ragged (partial) tail block.
    B3, C3, H3, W3 = 2, 4, 40, 128      # R=40, r_tile=32 -> 2 tiles, 8-row tail
    logits3 = jax.random.normal(keys[4], (B3, C3, H3, W3), dtype=jnp.float32)
    target3 = jax.random.randint(keys[5], (B3, H3, W3), 0, C3, dtype=jnp.int32)
    out3 = jax.block_until_ready(
        dice_loss(logits3, target3, num_classes=C3, max_block_bytes=64 * 1024))
    ref3 = _dice_loss_ref(logits3, target3, num_classes=C3)
    assert jnp.allclose(out3, ref3, **TOL), (out3, ref3)

    # 4) Multi-tile flat path with a ragged tail block (S=2100, TILE_S=1024).
    B4, C4, H4, W4 = 2, 4, 30, 70
    logits4 = jax.random.normal(keys[6], (B4, C4, H4, W4), dtype=jnp.float32)
    target4 = jax.random.randint(keys[7], (B4, H4, W4), 0, C4, dtype=jnp.int32)
    out4 = jax.block_until_ready(
        dice_loss(logits4, target4, num_classes=C4, max_block_bytes=16 * 1024))
    ref4 = _dice_loss_ref(logits4, target4, num_classes=C4)
    assert jnp.allclose(out4, ref4, **TOL), (out4, ref4)

    # 5) bf16 logits (itemsize-aware tiling; compute stays f32 in-kernel).
    logits5 = logits.astype(jnp.bfloat16)
    out5 = jax.block_until_ready(dice_loss(logits5, target, num_classes=C))
    ref5 = _dice_loss_ref(logits5, target, num_classes=C)
    assert jnp.allclose(out5, ref5, **TOL), (out5, ref5)

    print("KERNEL_OK")
</pallas_src>

<mosaic_0001>
module attributes {stable_mosaic.version = 11 : i64} {
  func.func @_dice_kernel_tiled(%arg0: i32, %arg1: i32, %arg2: memref<1x4x2x128xf32, #tpu.memory_space<vmem>>, %arg3: memref<1x1x2x128xi8, #tpu.memory_space<vmem>>, %arg4: memref<1x4x1xf32, #tpu.memory_space<vmem>>, %arg5: memref<4x128xf32, #tpu.memory_space<vmem>>, %arg6: memref<4x128xf32, #tpu.memory_space<vmem>>, %arg7: memref<4x128xf32, #tpu.memory_space<vmem>>) attributes {dimension_semantics = [#tpu.dimension_semantics<parallel>, #tpu.dimension_semantics<arbitrary>], iteration_bounds = array<i64: 2, 1>, scalar_prefetch = 0 : i64, scratch_operands = 3 : i64, tpu.core_type = #tpu.core_type<tc>, window_params = [{transform_indices = @transform_0, window_bounds = array<i64: 1, 4, 2, 128>}, {transform_indices = @transform_1, window_bounds = array<i64: 1, 1, 2, 128>}, {transform_indices = @transform_2, window_bounds = array<i64: 1, 4, 1>}]} {
    %c0_i32 = arith.constant 0 : i32
    %0 = arith.cmpi eq, %arg1, %c0_i32 : i32
    %1 = arith.extui %0 : i1 to i32
    %c0_i32_0 = arith.constant 0 : i32
    %2 = arith.cmpi ne, %1, %c0_i32_0 : i32
    scf.if %2 {
      %cst_37 = arith.constant 0.000000e+00 : f32
      %82 = vector.broadcast %cst_37 : f32 to vector<4x128xf32>
      %c0_38 = arith.constant 0 : index
      %c0_39 = arith.constant 0 : index
      %83 = vector.load %arg5[%c0_38, %c0_39] : memref<4x128xf32, #tpu.memory_space<vmem>>, vector<4x128xf32>
      tpu.vector_store %arg5[%c0_38, %c0_39], %82 {strides = array<i32>} : memref<4x128xf32, #tpu.memory_space<vmem>>, vector<4x128xf32>,
      %cst_40 = arith.constant 0.000000e+00 : f32
      %84 = vector.broadcast %cst_40 : f32 to vector<4x128xf32>
      %c0_41 = arith.constant 0 : index
      %c0_42 = arith.constant 0 : index
      %85 = vector.load %arg6[%c0_41, %c0_42] : memref<4x128xf32, #tpu.memory_space<vmem>>, vector<4x128xf32>
      tpu.vector_store %arg6[%c0_41, %c0_42], %84 {strides = array<i32>} : memref<4x128xf32, #tpu.memory_space<vmem>>, vector<4x128xf32>,
      %cst_43 = arith.constant 0.000000e+00 : f32
      %86 = vector.broadcast %cst_43 : f32 to vector<4x128xf32>
      %c0_44 = arith.constant 0 : index
      %c0_45 = arith.constant 0 : index
      %87 = vector.load %arg7[%c0_44, %c0_45] : memref<4x128xf32, #tpu.memory_space<vmem>>, vector<4x128xf32>
      tpu.vector_store %arg7[%c0_44, %c0_45], %86 {strides = array<i32>} : memref<4x128xf32, #tpu.memory_space<vmem>>, vector<4x128xf32>,
    } else {
    }
    %c0 = arith.constant 0 : index
    %c0_1 = arith.constant 0 : index
    %c0_2 = arith.constant 0 : index
    %c0_3 = arith.constant 0 : index
    %3 = vector.load %arg2[%c0, %c0_1, %c0_2, %c0_3] : memref<1x4x2x128xf32, #tpu.memory_space<vmem>>, vector<1x4x2x128xf32>
    %4 = vector.shape_cast %3 : vector<1x4x2x128xf32> to vector<4x2x128xf32>
    %c0_4 = arith.constant 0 : index
    %c0_5 = arith.constant 0 : index
    %c0_6 = arith.constant 0 : index
    %c0_7 = arith.constant 0 : index
    %5 = vector.load %arg3[%c0_4, %c0_5, %c0_6, %c0_7] : memref<1x1x2x128xi8, #tpu.memory_space<vmem>>, vector<1x1x2x128xi8>
    %6 = vector.shape_cast %5 : vector<1x1x2x128xi8> to vector<2x128xi8>
    %7 = arith.extsi %6 : vector<2x128xi8> to vector<2x128xi32>
    %cst = arith.constant dense<0xFF800000> : vector<2x128xf32>
    %8 = vector.multi_reduction <maximumf>, %4, %cst [0] : vector<4x2x128xf32> to vector<2x128xf32>
    %9 = vector.shape_cast %8 : vector<2x128xf32> to vector<1x2x128xf32>
    %10 = vector.broadcast %9 : vector<1x2x128xf32> to vector<4x2x128xf32>
    %11 = arith.subf %4, %10 : vector<4x2x128xf32>
    %12 = math.exp %11 : vector<4x2x128xf32>
    %cst_8 = arith.constant dense<0.000000e+00> : vector<2x128xf32>
    %13 = vector.multi_reduction <add>, %12, %cst_8 [0] : vector<4x2x128xf32> to vector<2x128xf32>
    %14 = vector.shape_cast %13 : vector<2x128xf32> to vector<1x2x128xf32>
    %15 = tpu.reciprocal %14 {approx = true} : vector<1x2x128xf32> -> vector<1x2x128xf32>
    %16 = vector.broadcast %15 : vector<1x2x128xf32> to vector<4x2x128xf32>
    %17 = arith.mulf %12, %16 : vector<4x2x128xf32>
    %c0_i32_9 = arith.constant 0 : i32
    %18 = vector.broadcast %c0_i32_9 : i32 to vector<2x128xi32>
    %19 = arith.cmpi eq, %7, %18 : vector<2x128xi32>
    %20 = vector.extract_strided_slice %17 {offsets = [0, 0, 0], sizes = [1, 2, 128], strides = [1, 1, 1]} : vector<4x2x128xf32> to vector<1x2x128xf32>
    %21 = vector.shape_cast %20 : vector<1x2x128xf32> to vector<2x128xf32>
    %cst_10 = arith.constant 0.000000e+00 : f32
    %22 = vector.broadcast %cst_10 : f32 to vector<2x128xf32>
    %23 = arith.select %19, %21, %22 : vector<2x128xi1>, vector<2x128xf32>
    %cst_11 = arith.constant dense<0.000000e+00> : vector<128xf32>
    %24 = vector.multi_reduction <add>, %23, %cst_11 [0] : vector<2x128xf32> to vector<128xf32>
    %25 = vector.shape_cast %24 : vector<128xf32> to vector<1x128xf32>
    %26 = arith.extui %19 : vector<2x128xi1> to vector<2x128xi32>
    %27 = arith.sitofp %26 : vector<2x128xi32> to vector<2x128xf32>
    %cst_12 = arith.constant dense<0.000000e+00> : vector<128xf32>
    %28 = vector.multi_reduction <add>, %27, %cst_12 [0] : vector<2x128xf32> to vector<128xf32>
    %29 = vector.shape_cast %28 : vector<128xf32> to vector<1x128xf32>
    %c1_i32 = arith.constant 1 : i32
    %30 = vector.broadcast %c1_i32 : i32 to vector<2x128xi32>
    %31 = arith.cmpi eq, %7, %30 : vector<2x128xi32>
    %32 = vector.extract_strided_slice %17 {offsets = [1, 0, 0], sizes = [1, 2, 128], strides = [1, 1, 1]} : vector<4x2x128xf32> to vector<1x2x128xf32>
    %33 = vector.shape_cast %32 : vector<1x2x128xf32> to vector<2x128xf32>
    %cst_13 = arith.constant 0.000000e+00 : f32
    %34 = vector.broadcast %cst_13 : f32 to vector<2x128xf32>
    %35 = arith.select %31, %33, %34 : vector<2x128xi1>, vector<2x128xf32>
    %cst_14 = arith.constant dense<0.000000e+00> : vector<128xf32>
    %36 = vector.multi_reduction <add>, %35, %cst_14 [0] : vector<2x128xf32> to vector<128xf32>
    %37 = vector.shape_cast %36 : vector<128xf32> to vector<1x128xf32>
    %38 = arith.extui %31 : vector<2x128xi1> to vector<2x128xi32>
    %39 = arith.sitofp %38 : vector<2x128xi32> to vector<2x128xf32>
    %cst_15 = arith.constant dense<0.000000e+00> : vector<128xf32>
    %40 = vector.multi_reduction <add>, %39, %cst_15 [0] : vector<2x128xf32> to vector<128xf32>
    %41 = vector.shape_cast %40 : vector<128xf32> to vector<1x128xf32>
    %c2_i32 = arith.constant 2 : i32
    %42 = vector.broadcast %c2_i32 : i32 to vector<2x128xi32>
    %43 = arith.cmpi eq, %7, %42 : vector<2x128xi32>
    %44 = vector.extract_strided_slice %17 {offsets = [2, 0, 0], sizes = [1, 2, 128], strides = [1, 1, 1]} : vector<4x2x128xf32> to vector<1x2x128xf32>
    %45 = vector.shape_cast %44 : vector<1x2x128xf32> to vector<2x128xf32>
    %cst_16 = arith.constant 0.000000e+00 : f32
    %46 = vector.broadcast %cst_16 : f32 to vector<2x128xf32>
    %47 = arith.select %43, %45, %46 : vector<2x128xi1>, vector<2x128xf32>
    %cst_17 = arith.constant dense<0.000000e+00> : vector<128xf32>
    %48 = vector.multi_reduction <add>, %47, %cst_17 [0] : vector<2x128xf32> to vector<128xf32>
    %49 = vector.shape_cast %48 : vector<128xf32> to vector<1x128xf32>
    %50 = arith.extui %43 : vector<2x128xi1> to vector<2x128xi32>
    %51 = arith.sitofp %50 : vector<2x128xi32> to vector<2x128xf32>
    %cst_18 = arith.constant dense<0.000000e+00> : vector<128xf32>
    %52 = vector.multi_reduction <add>, %51, %cst_18 [0] : vector<2x128xf32> to vector<128xf32>
    %53 = vector.shape_cast %52 : vector<128xf32> to vector<1x128xf32>
    %c3_i32 = arith.constant 3 : i32
    %54 = vector.broadcast %c3_i32 : i32 to vector<2x128xi32>
    %55 = arith.cmpi eq, %7, %54 : vector<2x128xi32>
    %56 = vector.extract_strided_slice %17 {offsets = [3, 0, 0], sizes = [1, 2, 128], strides = [1, 1, 1]} : vector<4x2x128xf32> to vector<1x2x128xf32>
    %57 = vector.shape_cast %56 : vector<1x2x128xf32> to vector<2x128xf32>
    %cst_19 = arith.constant 0.000000e+00 : f32
    %58 = vector.broadcast %cst_19 : f32 to vector<2x128xf32>
    %59 = arith.select %55, %57, %58 : vector<2x128xi1>, vector<2x128xf32>
    %cst_20 = arith.constant dense<0.000000e+00> : vector<128xf32>
    %60 = vector.multi_reduction <add>, %59, %cst_20 [0] : vector<2x128xf32> to vector<128xf32>
    %61 = vector.shape_cast %60 : vector<128xf32> to vector<1x128xf32>
    %62 = arith.extui %55 : vector<2x128xi1> to vector<2x128xi32>
    %63 = arith.sitofp %62 : vector<2x128xi32> to vector<2x128xf32>
    %cst_21 = arith.constant dense<0.000000e+00> : vector<128xf32>
    %64 = vector.multi_reduction <add>, %63, %cst_21 [0] : vector<2x128xf32> to vector<128xf32>
    %65 = vector.shape_cast %64 : vector<128xf32> to vector<1x128xf32>
    %c0_22 = arith.constant 0 : index
    %c0_23 = arith.constant 0 : index
    %66 = vector.load %arg5[%c0_22, %c0_23] : memref<4x128xf32, #tpu.memory_space<vmem>>, vector<4x128xf32>
    %67 = tpu.concatenate %25, %37, %49, %61 in 0 : vector<1x128xf32>, vector<1x128xf32>, vector<1x128xf32>, vector<1x128xf32> -> vector<4x128xf32>
    %68 = arith.addf %66, %67 : vector<4x128xf32>
    %c0_24 = arith.constant 0 : index
    %c0_25 = arith.constant 0 : index
    %69 = vector.load %arg5[%c0_24, %c0_25] : memref<4x128xf32, #tpu.memory_space<vmem>>, vector<4x128xf32>
    tpu.vector_store %arg5[%c0_24, %c0_25], %68 {strides = array<i32>} : memref<4x128xf32, #tpu.memory_space<vmem>>, vector<4x128xf32>,
    %c0_26 = arith.constant 0 : index
    %c0_27 = arith.constant 0 : index
    %70 = vector.load %arg7[%c0_26, %c0_27] : memref<4x128xf32, #tpu.memory_space<vmem>>, vector<4x128xf32>
    %71 = tpu.concatenate %29, %41, %53, %65 in 0 : vector<1x128xf32>, vector<1x128xf32>, vector<1x128xf32>, vector<1x128xf32> -> vector<4x128xf32>
    %72 = arith.addf %70, %71 : vector<4x128xf32>
    %c0_28 = arith.constant 0 : index
    %c0_29 = arith.constant 0 : index
    %73 = vector.load %arg7[%c0_28, %c0_29] : memref<4x128xf32, #tpu.memory_space<vmem>>, vector<4x128xf32>
    tpu.vector_store %arg7[%c0_28, %c0_29], %72 {strides = array<i32>} : memref<4x128xf32, #tpu.memory_space<vmem>>, vector<4x128xf32>,
    %c0_30 = arith.constant 0 : index
    %c0_31 = arith.constant 0 : index
    %74 = vector.load %arg6[%c0_30, %c0_31] : memref<4x128xf32, #tpu.memory_space<vmem>>, vector<4x128xf32>
    %75 = arith.mulf %17, %17 : vector<4x2x128xf32>
    %cst_32 = arith.constant dense<0.000000e+00> : vector<4x128xf32>
    %76 = vector.multi_reduction <add>, %75, %cst_32 [1] : vector<4x2x128xf32> to vector<4x128xf32>
    %77 = arith.addf %74, %76 : vector<4x128xf32>
    %c0_33 = arith.constant 0 : index
    %c0_34 = arith.constant 0 : index
    %78 = vector.load %arg6[%c0_33, %c0_34] : memref<4x128xf32, #tpu.memory_space<vmem>>, vector<4x128xf32>
    tpu.vector_store %arg6[%c0_33, %c0_34], %77 {strides = array<i32>} : memref<4x128xf32, #tpu.memory_space<vmem>>, vector<4x128xf32>,
    %c0_i32_35 = arith.constant 0 : i32
    %79 = arith.cmpi eq, %arg1, %c0_i32_35 : i32
    %80 = arith.extui %79 : i1 to i32
    %c0_i32_36 = arith.constant 0 : i32
    %81 = arith.cmpi ne, %80, %c0_i32_36 : i32
    scf.if %81 {
      %c0_37 = arith.constant 0 : index
      %c0_38 = arith.constant 0 : index
      %82 = vector.load %arg5[%c0_37, %c0_38] : memref<4x128xf32, #tpu.memory_space<vmem>>, vector<4x128xf32>
      %cst_39 = arith.constant dense<0.000000e+00> : vector<4xf32>
      %83 = vector.multi_reduction <add>, %82, %cst_39 [1] : vector<4x128xf32> to vector<4xf32>
      %84 = vector.shape_cast %83 : vector<4xf32> to vector<4x1xf32>
      %cst_40 = arith.constant 2.000000e+00 : f32
      %85 = vector.broadcast %cst_40 : f32 to vector<4x1xf32>
      %86 = arith.mulf %85, %84 : vector<4x1xf32>
      %cst_41 = arith.constant 1.000000e+00 : f32
      %87 = vector.broadcast %cst_41 : f32 to vector<4x1xf32>
      %88 = arith.addf %87, %86 : vector<4x1xf32>
      %c0_42 = arith.constant 0 : index
      %c0_43 = arith.constant 0 : index
      %89 = vector.load %arg6[%c0_42, %c0_43] : memref<4x128xf32, #tpu.memory_space<vmem>>, vector<4x128xf32>
      %cst_44 = arith.constant dense<0.000000e+00> : vector<4xf32>
      %90 = vector.multi_reduction <add>, %89, %cst_44 [1] : vector<4x128xf32> to vector<4xf32>
      %91 = vector.shape_cast %90 : vector<4xf32> to vector<4x1xf32>
      %cst_45 = arith.constant 1.000000e+00 : f32
      %92 = vector.broadcast %cst_45 : f32 to vector<4x1xf32>
      %93 = arith.addf %92, %91 : vector<4x1xf32>
      %c0_46 = arith.constant 0 : index
      %c0_47 = arith.constant 0 : index
      %94 = vector.load %arg7[%c0_46, %c0_47] : memref<4x128xf32, #tpu.memory_space<vmem>>, vector<4x128xf32>
      %cst_48 = arith.constant dense<0.000000e+00> : vector<4xf32>
      %95 = vector.multi_reduction <add>, %94, %cst_48 [1] : vector<4x128xf32> to vector<4xf32>
      %96 = vector.shape_cast %95 : vector<4xf32> to vector<4x1xf32>
      %97 = arith.addf %93, %96 : vector<4x1xf32>
      %98 = arith.divf %88, %97 : vector<4x1xf32>
      %cst_49 = arith.constant 1.000000e+00 : f32
      %99 = vector.broadcast %cst_49 : f32 to vector<4x1xf32>
      %100 = arith.subf %99, %98 : vector<4x1xf32>
      %c0_50 = arith.constant 0 : index
      %c0_51 = arith.constant 0 : index
      %c0_52 = arith.constant 0 : index
      %101 = vector.load %arg4[%c0_50, %c0_51, %c0_52] : memref<1x4x1xf32, #tpu.memory_space<vmem>>, vector<1x4x1xf32>
      %102 = vector.shape_cast %101 : vector<1x4x1xf32> to vector<4x1xf32>
      %103 = vector.shape_cast %100 : vector<4x1xf32> to vector<1x4x1xf32>
      tpu.vector_store %arg4[%c0_50, %c0_51, %c0_52], %103 {strides = array<i32>} : memref<1x4x1xf32, #tpu.memory_space<vmem>>, vector<1x4x1xf32>,
    } else {
    }
    return
  }
  func.func @transform_0(%arg0: i32, %arg1: i32) -> (i32, i32, i32, i32) {
    %c0_i32 = arith.constant 0 : i32
    %c0_i32_0 = arith.constant 0 : i32
    %c0_i32_1 = arith.constant 0 : i32
    return %arg0, %c0_i32, %arg1, %c0_i32_0 : i32, i32, i32, i32
  }
  func.func @transform_1(%arg0: i32, %arg1: i32) -> (i32, i32, i32, i32) {
    %c0_i32 = arith.constant 0 : i32
    %c0_i32_0 = arith.constant 0 : i32
    %c0_i32_1 = arith.constant 0 : i32
    return %arg0, %c0_i32, %arg1, %c0_i32_0 : i32, i32, i32, i32
  }
  func.func @transform_2(%arg0: i32, %arg1: i32) -> (i32, i32, i32) {
    %c0_i32 = arith.constant 0 : i32
    %c0_i32_0 = arith.constant 0 : i32
    %c0_i32_1 = arith.constant 0 : i32
    return %arg0, %c0_i32, %c0_i32_0 : i32, i32, i32
  }
}

</mosaic_0001>

<bundles_post_ra>
// kernel: tpu_custom_call.1
= control target key start
LH: loop header
LB: loop body
LE: loop exit
PB: predicated region body
PF: predicated region fallthrough
CT: control target
= control target key end

     0   :  { %7 = vsyncpa [#allocation6], 0  ;;  %s912_s0 = inlined_call_operand.hbm [shape: f32[2,4,2,128], index: 0, kind: input, shape index: {}]   ;;  %s913_s1 = inlined_call_operand.hbm [shape: s8[2,1,2,128], index: 1, kind: input, shape index: {}]   ;;  %s914_s2 = inlined_call_operand.vmem [shape: f32[2,4,1], index: 2, kind: output, shape index: {}]  }
   0x1   :  { %9 = vsyncpa [#allocation6 + $0x1], 0 }
   0x2   :  { %10 = vsyncpa [#allocation8], 0 }
   0x3   :  { %12 = vsyncpa [#allocation8 + $0x1], 0  ;;  %s737_s9 = smov 0   ;;  %s739_s10 = smov 0  }
   0x4   :  { %s741_s11 = smov 0   ;;  %s743_s12 = smov 0  }
   0x5   :  { %s745_s13 = smov 0   ;;  %s747_s14 = smov 0  }
   0x6 LB: > { %s512_s15 = sadd.s32 4294967295, %s715_s14   ;;  %s30_s16 = sadd.s32 1, %s711_s13  ;;  %s715_s14 = sphi %s747_s14, %s18_s14   ;;  %s711_s13 = sphi %s745_s13, %s923_s13   ;;  %s707_s12 = sphi %s743_s12, %s922_s12   ;;  %s703_s11 = sphi %s741_s11, %s921_s11   ;;  %s699_s10 = sphi %s739_s10, %s920_s10   ;;  %s695_s9 = sphi %s737_s9, %s919_s9  }
   0x7   : > { %p32_p0 = scmp.ge.s32.totalorder %s30_s16, 2  ;;  %s39_s17 = sadd.s32 1, %s703_s11 }
   0x8   : > { %p46_p1 = scmp.ne.s32.totalorder %s703_s11, %s699_s10  ;;  %p47_p2 = scmp.eq.s32.totalorder %s715_s14, 0 }
   0x9   : > { %s925_s16 = smov (%p32_p0, %s30_s16), 0  ;;  %p52_p4 = scmp.ne.s32.totalorder %s699_s10, %s695_s9 }
   0xa   : > { %p773_p3 = por %p47_p2, %p46_p1  ;;  %s34_s19 = ssub.s32 %s711_s13, %s925_s16 }
   0xb   : > { %p53_p5 = scmp.eq.s32.totalorder %s512_s15, 0  ;;  %p37_p6 = scmp.eq.s32.totalorder %s34_s19, 0 }
   0xc   : > { %p541_p8 = scmp.lt.s32.totalorder %s715_s14, 2  ;;  %s789_s22 = sand.u32 1, %s703_s11  }
   0xd   : > { %p780_p7 = por %p53_p5, %p52_p4  ;;  %s529_s23 = sshll.u32 %s711_s13, 7 }
   0xe   : > { %s786_s21 = scalar_select %p37_p6, %s703_s11, %s39_s17  }
   0xf   : > { %s516_s24 = sshll.u32 %s789_s22, 3  ;;  %s141_s27 = scalar_lea.hbm %s912_s0, %s529_s23 }
  0x10   : > { %s134_s28 = scalar_lea.vmem [#allocation5], %s516_s24  ;;  %p798_p9 = pnand %p541_p8, %p773_p3 }
  0x11   : > { %s142_s29 = sshll.u32 %s134_s28, 4  ;;  %s131_s3 = scalar_lea.sflag [#allocation6], %s789_s22  ;;  %s143_s29 = int_to_ptr.vmem [resolvable:$true] %s142_s29 }
  0x12   : > { %p607_p10 = pneg %p798_p9  ;;  %s618_s4 = scalar_lea.vmem %s143_s29, 128 }
  0x13   : > { %p619_p11 = scmp.ne.s32.totalorder %s143_s29, %s618_s4  ;;  %s717_s5 = smov [#allocation5]  }
  0x14   : > { %s623_s6 = sshll.u32 %s717_s5, 4  ;;  %s624_s6 = int_to_ptr.vmem [resolvable:$false] %s623_s6 }
  0x15   : > { %p621_p12 = pnand %p619_p11, %p607_p10  ;;  %s625_s7 = scalar_lea.vmem %s624_s6, 256 }
  0x16   : > { %p626_p0 = scmp.lt.s32.totalorder %s143_s29, %s624_s6  ;;  %p627_p1 = scmp.lt.s32.totalorder %s625_s7, %s618_s4 }
  0x17   : > { %p622_p13 = pneg %p621_p12 }
  0x18   : > { %p628_p2 = por %p627_p1, %p626_p0 }
  0x1a   : > { %p629_p3 = pnand %p628_p2, %p622_p13 }
  0x1c   : > { %632 = shalt.err (!%p629_p3)
}
  0x1d   : > { %s718_s8 = smov 32   ;;  %s719_s9 = smov 2  }
  0x1e   : > { %537 = dma.hbm_to_vmem [thread:$0]  (!%p798_p9), %s141_s27, 128, %s143_s29, %s131_s3, %s718_s8, %s718_s8, %s719_s9  }
  0x1f   : > { %p520_p4 = scmp.ge.s32.totalorder %s715_s14, 1  ;;  %p168_p5 = scmp.lt.s32.totalorder %s715_s14, 3 }
  0x20   : > { %s519_s17 = sshll.u32 %s711_s13, 4  ;;  %s155_s24 = scalar_lea.vmem [#allocation7], %s789_s22 }
  0x21   : > { %p812_p6 = pnand %p520_p4, %p168_p5  ;;  %s161_s23 = scalar_lea.hbm %s913_s1, %s519_s17 }
  0x22   : > { %s163_s25 = sshll.u32 %s155_s24, 4  ;;  %s153_s26 = scalar_lea.sflag [#allocation8], %s789_s22  ;;  %s164_s25 = int_to_ptr.vmem [resolvable:$true] %s163_s25 }
  0x23   : > { %s646_s28 = scalar_lea.vmem %s164_s25, 16  ;;  %s720_s27 = smov [#allocation7]  }
  0x24   : > { %p647_p8 = scmp.ne.s32.totalorder %s164_s25, %s646_s28  ;;  %s651_s29 = sshll.u32 %s720_s27, 4  ;;  %s652_s29 = int_to_ptr.vmem [resolvable:$false] %s651_s29 }
  0x25   : > { %s653_s3 = scalar_lea.vmem %s652_s29, 32  ;;  %p654_p13 = scmp.lt.s32.totalorder %s164_s25, %s652_s29 }
  0x26   : > { %p649_p11 = pnand %p647_p8, %p607_p10  ;;  %p655_p0 = scmp.lt.s32.totalorder %s653_s3, %s646_s28 }
  0x28   : > { %p650_p12 = pneg %p649_p11  ;;  %p656_p1 = por %p655_p0, %p654_p13 }
  0x2a   : > { %p657_p2 = pnand %p656_p1, %p650_p12 }
  0x2c   : > { %660 = shalt.err (!%p657_p2)
}
  0x2d   : > { %540 = dma.hbm_to_vmem [thread:$0]  (!%p798_p9), %s161_s23, 16, %s164_s25, %s153_s26  }
  0x2e   : > { %172 = sbr.rel (%p812_p6) target bundleno = 296 (0x128), region = 28  ;;  %s174_s22 = sand.u32 (!%p812_p6), 1, %s699_s10  }
  0x2f   : > { %s521_s4 = sshll.u32 (!%p812_p6), %s174_s22, 3  ;;  %s175_s5 = scalar_lea.sflag (!%p812_p6), [#allocation6], %s174_s22 }
  0x30   : > { %s178_s6 = scalar_lea.vmem (!%p812_p6), [#allocation5], %s521_s4 }
  0x33   : > { %686 = dma.done.wait (%p780_p7), %s175_s5, 128  }
  0x34   : > { %688 = vsyncadd (%p780_p7), %s175_s5, 4294967168  ;;  %s184_s7 = scalar_lea.sflag [#allocation8], %s174_s22  ;;  %s186_s8 = scalar_lea.vmem [#allocation7], %s174_s22 }
  0x35   : > { %690 = dma.done.wait (%p780_p7), %s184_s7, 16  }
  0x36   : > { %692 = vsyncadd (%p780_p7), %s184_s7, 4294967280  ;;  %v721_v0 = vmov 0.0   ;;  %vm227_vm0 = vcmask 1041408   ;;  %v221_v1 = vld [vmem:[%s178_s6] sm:$0x3]  ;;  %vm332_vm5 = vcmask 1040384  }
  0x37   : > { %219 = vst [vmem:[#allocation3] sm:$0xf] %v721_v0  ;;  %218 = vst [vmem:[#allocation2] sm:$0xf] %v721_v0  ;;  %v222_v2 = vld [vmem:[%s178_s6 + $0x2] sm:$0x3] }
  0x38   : > { %220 = vst [vmem:[#allocation4] sm:$0xf] %v721_v0  ;;  %v223_v3 = vld [vmem:[%s178_s6 + $0x4] sm:$0x3]  ;;  %v224_v4 = vld [vmem:[%s178_s6 + $0x6] sm:$0x3] }
  0x39   : > { %v228_v5 = vsel %vm227_vm0, %v221_v1, -inf  ;;  %v229_v6 = vsel %vm227_vm0, %v222_v2, -inf  ;;  %v230_v7 = vsel %vm227_vm0, %v223_v3, -inf  ;;  %v231_v8 = vsel %vm227_vm0, %v224_v4, -inf  ;;  %v225_v10 = vld [vmem:[%s186_s8] sm:$0x1] }
  0x3a   : > { %v232_v9 = vmax.f32 %v228_v5, %v229_v6  ;;  %v233_v11 = vmax.f32 %v230_v7, %v231_v8  ;;  %v842_v12 = vunpack.c.0.s8 %v225_v10  ;;  %vm335_vm6 = vcmask 1042432   ;;  %p210_p7 = scmp.lt.s32.totalorder %s707_s12, 1 }
  0x3b   : > { %vm382_vm7 = vcmask 1041409   ;;  %vm384_vm8 = vcmask 1042434   ;;  %vm386_vm9 = vcmask 1043459   ;;  %vm395_vm10 = vcmask 1043456  }
  0x3c   : > { %v234_v13 = vmax.f32 %v232_v9, %v233_v11  ;;  %vm259_vm1 = vcmp.eq.s32.totalorder %v842_v12, 0  ;;  %vm277_vm2 = vcmp.eq.s32.totalorder %v842_v12, 1  ;;  %vm295_vm3 = vcmp.eq.s32.totalorder %v842_v12, 2  ;;  %s927_s12 = smov (!%p210_p7, %s707_s12), 1 }
  0x3d   : > { %v523_v14 = vsel %vm259_vm1, 1.0, %v721_v0  ;;  %v524_v15 = vsel %vm277_vm2, 1.0, %v721_v0  ;;  %v525_v16 = vsel %vm295_vm3, 1.0, %v721_v0  ;;  %vm313_vm4 = vcmp.eq.s32.totalorder %v842_v12, 3  ;;  %s522_s20 = sshll.u32 %s927_s12, 2 }
  0x3e   : > { %v235_v17 = vsub.f32 %v221_v1, %v234_v13  ;;  %v236_v18 = vsub.f32 %v222_v2, %v234_v13  ;;  %v237_v19 = vsub.f32 %v223_v3, %v234_v13  ;;  %v238_v20 = vsub.f32 %v224_v4, %v234_v13  ;;  %s213_s15 = scalar_lea.vmem %s914_s2, %s522_s20 }
  0x3f   : > { %v270_v21 = vsel %vm227_vm0, %v523_v14, 0.0  ;;  %v288_v22 = vsel %vm227_vm0, %v524_v15, 0.0  ;;  %v306_v23 = vsel %vm227_vm0, %v525_v16, 0.0  ;;  %v526_v24 = vsel %vm313_vm4, 1.0, %v721_v0  ;;  %v339_v55 = vld [vmem:[#allocation4] sm:$0xf] }
  0x40   : > { %v239_v25 = vmul.f32 1.442695, %v235_v17  ;;  %v241_v26 = vmul.f32 1.442695, %v236_v18  ;;  %v243_v27 = vmul.f32 1.442695, %v237_v19 }
  0x41   : > { %v245_v28 = vmul.f32 1.442695, %v238_v20  ;;  %v271_v29 = vrot.slane %v270_v21, 4  ;;  %v289_v30 = vrot.slane %v288_v22, 4  ;;  %v307_v31 = vrot.slane %v306_v23, 4 }
  0x42   : > { %593 = vpow2.f32 %v239_v25  ;;  %v324_v32 = vsel %vm227_vm0, %v526_v24, 0.0  ;;  %vm414_vm11 = vcmask 3072  }
  0x43   : > { %595 = vpow2.f32 %v241_v26  ;;  %v272_v33 = vadd.f32 %v271_v29, %v270_v21  ;;  %v290_v34 = vadd.f32 %v289_v30, %v288_v22  ;;  %v308_v35 = vadd.f32 %v307_v31, %v306_v23 }
  0x44   : > { %597 = vpow2.f32 %v243_v27  ;;  %v325_v36 = vrot.slane %v324_v32, 4 }
  0x45   : > { %599 = vpow2.f32 %v245_v28  ;;  %v273_v37 = vrot.slane %v272_v33, 2  ;;  %v291_v38 = vrot.slane %v290_v34, 2  ;;  %v309_v39 = vrot.slane %v308_v35, 2 }
  0x46   : > { %v326_v40 = vadd.f32 %v325_v36, %v324_v32 }
  0x47   : > { %v274_v41 = vadd.f32 %v273_v37, %v272_v33  ;;  %v292_v42 = vadd.f32 %v291_v38, %v290_v34  ;;  %v310_v43 = vadd.f32 %v309_v39, %v308_v35 }
  0x48   : > { %v327_v44 = vrot.slane %v326_v40, 2 }
  0x49   : > { %v275_v45 = vrot.slane %v274_v41, 1  ;;  %v293_v46 = vrot.slane %v292_v42, 1  ;;  %v311_v47 = vrot.slane %v310_v43, 1 }
  0x4a   : > { %v328_v48 = vadd.f32 %v327_v44, %v326_v40 }
  0x4b   : > { %v276_v49 = vadd.f32 %v275_v45, %v274_v41  ;;  %v294_v50 = vadd.f32 %v293_v46, %v292_v42  ;;  %v312_v51 = vadd.f32 %v311_v47, %v310_v43 }
  0x4c   : > { %v329_v52 = vrot.slane %v328_v48, 1 }
  0x4d   : > { %v340_v53 = vsel %vm332_vm5, %v276_v49, %v294_v50 }
  0x4e   : > { %v330_v54 = vadd.f32 %v329_v52, %v328_v48  ;;  %v341_v56 = vsel %vm227_vm0, %v340_v53, %v312_v51 }
  0x4f   : > { %v594_v57 = vpop.eup %593 }
  0x50   : > { %v596_v58 = vpop.eup %595  ;;  %v247_v59 = vsel %vm227_vm0, %v594_v57, 0.0  ;;  %v342_v60 = vsel %vm335_vm6, %v341_v56, %v330_v54 }
  0x51   : > { %v598_v61 = vpop.eup %597  ;;  %v248_v62 = vsel %vm227_vm0, %v596_v58, 0.0  ;;  %v343_v63 = vadd.f32 %v342_v60, %v339_v55 }
  0x52   : > { %v600_v0 = vpop.eup %599  ;;  %v249_v1 = vadd.f32 %v248_v62, %v247_v59  ;;  %v250_v2 = vsel %vm227_vm0, %v598_v61, 0.0 }
  0x53   : > { %v252_v3 = vsel %vm227_vm0, %v600_v0, 0.0  ;;  %344 = vst [vmem:[#allocation4] sm:$0xf] %v343_v63 }
  0x54   : > { %v251_v4 = vadd.f32 %v250_v2, %v249_v1 }
  0x56   : > { %v253_v5 = vadd.f32 %v252_v3, %v251_v4 }
  0x58   : > { %601 = vrcp.f32 %v253_v5 }
  0x65   : > { %v602_v6 = vpop.eup %601 }
  0x66   : > { %v255_v7 = vmul.f32 %v602_v6, %v594_v57  ;;  %v256_v8 = vmul.f32 %v602_v6, %v596_v58  ;;  %v257_v9 = vmul.f32 %v602_v6, %v598_v61  ;;  %v258_v10 = vmul.f32 %v602_v6, %v600_v0 }
  0x68   : > { %v346_v11 = vmul.f32 %v255_v7, %v255_v7  ;;  %v347_v13 = vmul.f32 %v256_v8, %v256_v8  ;;  %v348_v14 = vmul.f32 %v257_v9, %v257_v9  ;;  %v349_v15 = vmul.f32 %v258_v10, %v258_v10 }
  0x69   : > { %v260_v16 = vsel %vm259_vm1, %v255_v7, 0.0  ;;  %v278_v17 = vsel %vm277_vm2, %v256_v8, 0.0  ;;  %v296_v18 = vsel %vm295_vm3, %v257_v9, 0.0  ;;  %v314_v19 = vsel %vm313_vm4, %v258_v10, 0.0  ;;  %v345_v7 = vld [vmem:[#allocation3] sm:$0xf] }
  0x6a   : > { %v350_v20 = vsel %vm227_vm0, %v346_v11, 0.0  ;;  %v357_v21 = vsel %vm227_vm0, %v347_v13, 0.0  ;;  %v364_v22 = vsel %vm227_vm0, %v348_v14, 0.0  ;;  %v371_v23 = vsel %vm227_vm0, %v349_v15, 0.0 }
  0x6b   : > { %v351_v24 = vrot.slane %v350_v20, 4  ;;  %v358_v25 = vrot.slane %v357_v21, 4  ;;  %v365_v26 = vrot.slane %v364_v22, 4  ;;  %v372_v27 = vrot.slane %v371_v23, 4 }
  0x6c   : > { %v261_v28 = vsel %vm227_vm0, %v260_v16, 0.0  ;;  %v279_v29 = vsel %vm227_vm0, %v278_v17, 0.0  ;;  %v297_v12 = vsel %vm227_vm0, %v296_v18, 0.0  ;;  %v315_v30 = vsel %vm227_vm0, %v314_v19, 0.0  ;;  %v331_v17 = vld [vmem:[#allocation2] sm:$0xf] }
  0x6d   : > { %v352_v31 = vadd.f32 %v351_v24, %v350_v20  ;;  %v359_v32 = vadd.f32 %v358_v25, %v357_v21  ;;  %v366_v33 = vadd.f32 %v365_v26, %v364_v22  ;;  %v373_v34 = vadd.f32 %v372_v27, %v371_v23  ;;  %v406_v23 = vld [vmem:[#allocation4] sm:$0xf] }
  0x6e   : > { %v262_v35 = vrot.slane %v261_v28, 4  ;;  %v280_v36 = vrot.slane %v279_v29, 4  ;;  %v298_v37 = vrot.slane %v297_v12, 4  ;;  %v316_v38 = vrot.slane %v315_v30, 4 }
  0x6f   : > { %v353_v39 = vrot.slane %v352_v31, 2  ;;  %v360_v40 = vrot.slane %v359_v32, 2  ;;  %v367_v41 = vrot.slane %v366_v33, 2  ;;  %v374_v42 = vrot.slane %v373_v34, 2 }
  0x70   : > { %v263_v43 = vadd.f32 %v262_v35, %v261_v28  ;;  %v281_v44 = vadd.f32 %v280_v36, %v279_v29  ;;  %v299_v45 = vadd.f32 %v298_v37, %v297_v12  ;;  %v317_v46 = vadd.f32 %v316_v38, %v315_v30 }
  0x71   : > { %v354_v47 = vadd.f32 %v353_v39, %v352_v31  ;;  %v361_v48 = vadd.f32 %v360_v40, %v359_v32  ;;  %v368_v49 = vadd.f32 %v367_v41, %v366_v33  ;;  %v375_v50 = vadd.f32 %v374_v42, %v373_v34 }
  0x72   : > { %v264_v51 = vrot.slane %v263_v43, 2  ;;  %v282_v52 = vrot.slane %v281_v44, 2  ;;  %v300_v53 = vrot.slane %v299_v45, 2  ;;  %v318_v54 = vrot.slane %v317_v46, 2 }
  0x73   : > { %v355_v55 = vrot.slane %v354_v47, 1  ;;  %v362_v56 = vrot.slane %v361_v48, 1  ;;  %v369_v57 = vrot.slane %v368_v49, 1  ;;  %v376_v58 = vrot.slane %v375_v50, 1 }
  0x74   : > { %v265_v59 = vadd.f32 %v264_v51, %v263_v43  ;;  %v283_v60 = vadd.f32 %v282_v52, %v281_v44  ;;  %v301_v61 = vadd.f32 %v300_v53, %v299_v45  ;;  %v319_v62 = vadd.f32 %v318_v54, %v317_v46 }
  0x75   : > { %v356_v63 = vadd.f32 %v355_v55, %v354_v47  ;;  %v363_v0 = vadd.f32 %v362_v56, %v361_v48  ;;  %v370_v1 = vadd.f32 %v369_v57, %v368_v49  ;;  %v377_v2 = vadd.f32 %v376_v58, %v375_v50 }
  0x76   : > { %v266_v3 = vrot.slane %v265_v59, 1  ;;  %v284_v4 = vrot.slane %v283_v60, 1  ;;  %v302_v5 = vrot.slane %v301_v61, 1  ;;  %v320_v6 = vrot.slane %v319_v62, 1 }
  0x77   : > { %v383_v8 = vsel %vm382_vm7, %v363_v0, %v356_v63  ;;  %v407_v25 = vsel %vm395_vm10, %v406_v23, 0.0 }
  0x78   : > { %v385_v9 = vsel %vm384_vm8, %v370_v1, %v383_v8  ;;  %v267_v10 = vadd.f32 %v266_v3, %v265_v59  ;;  %v285_v11 = vadd.f32 %v284_v4, %v283_v60  ;;  %v303_v13 = vadd.f32 %v302_v5, %v301_v61 }
  0x79   : > { %v387_v14 = vsel %vm386_vm9, %v377_v2, %v385_v9  ;;  %v321_v15 = vadd.f32 %v320_v6, %v319_v62 }
  0x7a   : > { %v389_v16 = vadd.f32 %v387_v14, %v345_v7  ;;  %v333_v18 = vsel %vm332_vm5, %v267_v10, %v285_v11 }
  0x7b   : > { %v334_v19 = vsel %vm227_vm0, %v333_v18, %v303_v13 }
  0x7c   : > { %390 = vst [vmem:[#allocation3] sm:$0xf] %v389_v16  ;;  %v336_v20 = vsel %vm335_vm6, %v334_v19, %v321_v15 }
  0x7d   : > { %v337_v21 = vadd.f32 %v336_v20, %v331_v17 }
  0x7f   : > { %338 = vst [vmem:[#allocation2] sm:$0xf] %v337_v21 }
  0x83   : > { %v401_v22 = vld [vmem:[#allocation3] sm:$0xf] }
  0x84   : > { %v402_v24 = vsel %vm395_vm10, %v401_v22, 0.0 }
  0x85   : > { %403 = vadd.xlane.f32.xlu0 %v402_v24 }
  0x86   : > { %v394_v26 = vld [vmem:[#allocation2] sm:$0xf] }
  0x87   : > { %v396_v27 = vsel %vm395_vm10, %v394_v26, 0.0 }
  0x88   : > { %397 = vadd.xlane.f32.xlu1 %v396_v27 }
  0x89   : > { %408 = vadd.xlane.f32.xlu0 %v407_v25 }
 0x10e   : > { %v404_v28 = vpop.xlane.xlu0 %403 }
 0x10f   : > { %v405_v29 = vadd.f32 1.0, %v404_v28 }
 0x111   : > { %v398_v31 = vpop.xlane.xlu1 %397 }
 0x112   : > { %v409_v12 = vpop.xlane.xlu0 %408  ;;  %v399_v32 = vmul.f32 2.0, %v398_v31 }
 0x113   : > { %v410_v30 = vadd.f32 %v409_v12, %v405_v29 }
 0x114   : > { %v400_v33 = vadd.f32 1.0, %v399_v32 }
 0x115   : > { %603 = vrcp.f32 %v410_v30 }
 0x122   : > { %v604_v34 = vpop.eup %603 }
 0x123   : > { %v412_v35 = vmul.f32 %v604_v34, %v400_v33 }
 0x125   : > { %v413_v36 = vsub.f32 1.0, %v412_v35 }
 0x127   : > { %415 = vst.msk [vmem:[%s213_s15] sm:$0xf] %vm414_vm11, %v413_v36 }
 0x128 PF: > { %s18_s14 = sadd.s32 1, %s715_s14   ;;  %s919_s9 = smov %s699_s10 }
 0x129   : > { %p15_p9 = scmp.ge.s32.totalorder %s18_s14, 4   ;;  %s920_s10 = smov %s703_s11 }
 0x12a   : > { %s921_s11 = smov %s786_s21  ;;  %s922_s12 = smov %s711_s13 }
 0x12b   : > { %s923_s13 = smov %s925_s16  ;;  %17 = sbr.rel (!%p15_p9) target bundleno = 6 (0x6), region = 89 }
 0x130   :  { %435 = vsyncpa [#allocation6], 1 }
 0x131   :  { %437 = vsyncpa [#allocation6 + $0x1], 1 }
 0x132   :  { %438 = vsyncpa [#allocation8], 1 }
 0x133   :  { %440 = vsyncpa [#allocation8 + $0x1], 1 }

</bundles_post_ra>
